<compile_context>
chip_gen: v7x
topology: tpu7x:2x2x1
jax: 0.10.0
libtpu: 0.0.40
codegen_flags: <defaults>
</compile_context>

<pallas_src>
import jax
import jax.numpy as jnp
import numpy as np
from jax.experimental import pallas as pl
from jax.experimental.pallas import tpu as pltpu


def _round_up(x, m):
    return ((x + m - 1) // m) * m


def critic_v_kernel(x_ref, w1_ref, b1_ref, w2_ref, b2_ref,
                    w3_ref, b3_ref, w4_ref, b4_ref, o_ref):
    """One batch tile of the value MLP, batch-on-lanes orientation.

    x_ref : (num_inputs, TILE_B) f32       w1_ref : (hidden, num_inputs) f32
    w2_ref, w3_ref : (hidden, hidden) f32  b{1,2,3}_ref : (hidden, 1) f32
    w4_ref : (hidden, 1) f32               b4_ref : (1, 1) f32 in SMEM
    o_ref : (1, TILE_B) f32
    """
    x = x_ref[...]

    # Layer 1: Linear(num_inputs, hidden) + ReLU.  (hidden, B) = W1 @ x_T.
    h = jnp.dot(w1_ref[...], x, preferred_element_type=jnp.float32)
    h = jnp.maximum(h + b1_ref[...], 0.0)
    # TODO(synk): nn.Dropout(0.5) has no deterministic train-mode forward;
    # implemented as identity (eval-mode semantics).

    # Layer 2: Linear(hidden, hidden) + ReLU.
    h = jnp.dot(w2_ref[...], h, preferred_element_type=jnp.float32)
    h = jnp.maximum(h + b2_ref[...], 0.0)

    # Layer 3: Linear(hidden, hidden) + ReLU.
    h = jnp.dot(w3_ref[...], h, preferred_element_type=jnp.float32)
    h = jnp.maximum(h + b3_ref[...], 0.0)

    # Output head (hidden -> 1): VPU multiply + sublane reduce; the result is
    # already a lane-dense (1, TILE_B) row, so the store uses full vst lanes.
    v = jnp.sum(h * w4_ref[...], axis=0, keepdims=True)       # (1, TILE_B)
    o_ref[...] = v + b4_ref[0, 0]


def critic_v_forward(state, params, *, tile_b=4096):
    """state: [B, num_inputs] f32. params: PyTorch-layout ([out, in]) weights."""
    B, num_inputs = state.shape
    hidden = params["w1"].shape[0]

    # Batch-on-lanes: feed state transposed so the batch dim maps to lanes.
    # (Single small XLA transpose in the wrapper; no pad, no dtype cast.)
    x_t = jnp.transpose(state).astype(jnp.float32)             # (num_inputs, B)

    # Tile-size selection:
    #   * large tiles amortize per-grid-step overhead,
    #   * keep >=2 tiles for large batches so v7x's two TensorCores both work,
    #   * lane-dim blocks must be a multiple of 128 unless they equal B.
    if B <= tile_b:
        tile_b = _round_up(pl.cdiv(B, 2), 128) if B >= 512 else B
    else:
        tile_b = _round_up(int(tile_b), 128)
    num_tiles = pl.cdiv(B, tile_b)
    b_pad = num_tiles * tile_b   # padded output alloc; last input tile reads
                                 # past B, garbage columns sliced off below.

    w4_col = params["w4"].reshape(hidden, 1)
    b4 = params["b4"].reshape(1, 1)

    # Weights/biases: same block every grid step -> DMA'd once, VMEM-resident.
    const = lambda a: pl.BlockSpec(a.shape, lambda i: (0,) * a.ndim)

    out = pl.pallas_call(
        critic_v_kernel,
        out_shape=jax.ShapeDtypeStruct((1, b_pad), jnp.float32),
        grid=(num_tiles,),
        in_specs=[
            pl.BlockSpec((num_inputs, tile_b), lambda i: (0, i)),  # state tile
            const(params["w1"]), const(params["b1"]),
            const(params["w2"]), const(params["b2"]),
            const(params["w3"]), const(params["b3"]),
            const(w4_col),
            pl.BlockSpec(memory_space=pltpu.MemorySpace.SMEM),      # b4 scalar
        ],
        out_specs=pl.BlockSpec((1, tile_b), lambda i: (0, i)),
        compiler_params=pltpu.CompilerParams(
            dimension_semantics=("parallel",),
        ),
    )(x_t, params["w1"], params["b1"], params["w2"], params["b2"],
      params["w3"], params["b3"], w4_col, b4)

    return out.reshape(b_pad, 1)[:B]


def init_critic_v_params(key, num_inputs, hidden_size, init_w=0.003):
    """Deterministic init matching the PyTorch module's __init__ ranges.
    Weights stored in PyTorch-native [out, in] layout; biases as [out, 1]."""
    k = jax.random.split(key, 8)
    u = lambda kk, shape, lim: jax.random.uniform(
        kk, shape, jnp.float32, minval=-lim, maxval=lim)

    lim1 = 1.0 / np.sqrt(num_inputs)
    limh = 1.0 / np.sqrt(hidden_size)
    return {
        "w1": u(k[0], (hidden_size, num_inputs), lim1),
        "b1": u(k[1], (hidden_size, 1), lim1),
        "w2": u(k[2], (hidden_size, hidden_size), limh),
        "b2": u(k[3], (hidden_size, 1), limh),
        "w3": u(k[4], (hidden_size, hidden_size), limh),
        "b3": u(k[5], (hidden_size, 1), limh),
        "w4": u(k[6], (1, hidden_size), init_w),
        "b4": u(k[7], (1, 1), init_w),
    }


if __name__ == "__main__":
    key = jax.random.PRNGKey(0)
    k_params, k_state = jax.random.split(key)

    batch = 8
    num_inputs = 16
    hidden_size = 32
    num_actions = 4  # unused by CriticV.forward (V-function takes state only)

    params = init_critic_v_params(k_params, num_inputs, hidden_size)
    state = jax.random.normal(k_state, (batch, num_inputs), dtype=jnp.float32)

    out = jax.block_until_ready(critic_v_forward(state, params))
    assert out.shape == (batch, 1), out.shape

    # Pure-JAX f32 reference mirroring the PyTorch forward (dropout = eval/identity).
    h = jnp.maximum(state @ params["w1"].T + params["b1"].T, 0.0)
    h = jnp.maximum(h @ params["w2"].T + params["b2"].T, 0.0)
    h = jnp.maximum(h @ params["w3"].T + params["b3"].T, 0.0)
    ref = h @ params["w4"].T + params["b4"]

    assert jnp.allclose(out, ref, atol=1e-3, rtol=1e-2), (
        f"max abs diff {jnp.max(jnp.abs(out - ref))}")

    print("KERNEL_OK")
</pallas_src>

<mosaic_0001>
module attributes {stable_mosaic.version = 11 : i64} {
  func.func @critic_v_kernel(%arg0: i32, %arg1: memref<16x8xf32, #tpu.memory_space<vmem>>, %arg2: memref<32x16xf32, #tpu.memory_space<vmem>>, %arg3: memref<32x1xf32, #tpu.memory_space<vmem>>, %arg4: memref<32x32xf32, #tpu.memory_space<vmem>>, %arg5: memref<32x1xf32, #tpu.memory_space<vmem>>, %arg6: memref<32x32xf32, #tpu.memory_space<vmem>>, %arg7: memref<32x1xf32, #tpu.memory_space<vmem>>, %arg8: memref<32x1xf32, #tpu.memory_space<vmem>>, %arg9: memref<1x1xf32, #tpu.memory_space<smem>>, %arg10: memref<1x8xf32, #tpu.memory_space<vmem>>) attributes {dimension_semantics = [#tpu.dimension_semantics<parallel>], iteration_bounds = array<i64: 1>, scalar_prefetch = 0 : i64, scratch_operands = 0 : i64, tpu.core_type = #tpu.core_type<tc>, window_params = [{transform_indices = @transform_0, window_bounds = array<i64: 16, 8>}, {pipeline_mode = #tpu.pipeline_mode<synchronous>, transform_indices = @transform_1, window_bounds = array<i64: 32, 16>}, {pipeline_mode = #tpu.pipeline_mode<synchronous>, transform_indices = @transform_2, window_bounds = array<i64: 32, 1>}, {pipeline_mode = #tpu.pipeline_mode<synchronous>, transform_indices = @transform_3, window_bounds = array<i64: 32, 32>}, {pipeline_mode = #tpu.pipeline_mode<synchronous>, transform_indices = @transform_4, window_bounds = array<i64: 32, 1>}, {pipeline_mode = #tpu.pipeline_mode<synchronous>, transform_indices = @transform_5, window_bounds = array<i64: 32, 32>}, {pipeline_mode = #tpu.pipeline_mode<synchronous>, transform_indices = @transform_6, window_bounds = array<i64: 32, 1>}, {pipeline_mode = #tpu.pipeline_mode<synchronous>, transform_indices = @transform_7, window_bounds = array<i64: 32, 1>}, {transform_indices = @transform_8, window_bounds = array<i64: 1, 1>}, {transform_indices = @transform_9, window_bounds = array<i64: 1, 8>}]} {
    %c0 = arith.constant 0 : index
    %c0_0 = arith.constant 0 : index
    %0 = vector.load %arg1[%c0, %c0_0] : memref<16x8xf32, #tpu.memory_space<vmem>>, vector<16x8xf32>
    %c0_1 = arith.constant 0 : index
    %c0_2 = arith.constant 0 : index
    %1 = vector.load %arg2[%c0_1, %c0_2] : memref<32x16xf32, #tpu.memory_space<vmem>>, vector<32x16xf32>
    %cst = arith.constant dense<0.000000e+00> : vector<32x8xf32>
    %2 = tpu.matmul %1, %0, %cst {dimension_numbers = #tpu.dot_dimension_numbers<[1], [0], [0], [1], [0, 0, 1, 1], [], []>} : vector<32x16xf32>, vector<16x8xf32>, vector<32x8xf32> -> vector<32x8xf32>
    %c0_3 = arith.constant 0 : index
    %c0_4 = arith.constant 0 : index
    %3 = vector.load %arg3[%c0_3, %c0_4] : memref<32x1xf32, #tpu.memory_space<vmem>>, vector<32x1xf32>
    %4 = vector.broadcast %3 : vector<32x1xf32> to vector<32x8xf32>
    %5 = arith.addf %2, %4 : vector<32x8xf32>
    %cst_5 = arith.constant 0.000000e+00 : f32
    %6 = vector.broadcast %cst_5 : f32 to vector<32x8xf32>
    %7 = arith.maximumf %5, %6 : vector<32x8xf32>
    %c0_6 = arith.constant 0 : index
    %c0_7 = arith.constant 0 : index
    %8 = vector.load %arg4[%c0_6, %c0_7] : memref<32x32xf32, #tpu.memory_space<vmem>>, vector<32x32xf32>
    %cst_8 = arith.constant dense<0.000000e+00> : vector<32x8xf32>
    %9 = tpu.matmul %8, %7, %cst_8 {dimension_numbers = #tpu.dot_dimension_numbers<[1], [0], [0], [1], [0, 0, 1, 1], [], []>} : vector<32x32xf32>, vector<32x8xf32>, vector<32x8xf32> -> vector<32x8xf32>
    %c0_9 = arith.constant 0 : index
    %c0_10 = arith.constant 0 : index
    %10 = vector.load %arg5[%c0_9, %c0_10] : memref<32x1xf32, #tpu.memory_space<vmem>>, vector<32x1xf32>
    %11 = vector.broadcast %10 : vector<32x1xf32> to vector<32x8xf32>
    %12 = arith.addf %9, %11 : vector<32x8xf32>
    %cst_11 = arith.constant 0.000000e+00 : f32
    %13 = vector.broadcast %cst_11 : f32 to vector<32x8xf32>
    %14 = arith.maximumf %12, %13 : vector<32x8xf32>
    %c0_12 = arith.constant 0 : index
    %c0_13 = arith.constant 0 : index
    %15 = vector.load %arg6[%c0_12, %c0_13] : memref<32x32xf32, #tpu.memory_space<vmem>>, vector<32x32xf32>
    %cst_14 = arith.constant dense<0.000000e+00> : vector<32x8xf32>
    %16 = tpu.matmul %15, %14, %cst_14 {dimension_numbers = #tpu.dot_dimension_numbers<[1], [0], [0], [1], [0, 0, 1, 1], [], []>} : vector<32x32xf32>, vector<32x8xf32>, vector<32x8xf32> -> vector<32x8xf32>
    %c0_15 = arith.constant 0 : index
    %c0_16 = arith.constant 0 : index
    %17 = vector.load %arg7[%c0_15, %c0_16] : memref<32x1xf32, #tpu.memory_space<vmem>>, vector<32x1xf32>
    %18 = vector.broadcast %17 : vector<32x1xf32> to vector<32x8xf32>
    %19 = arith.addf %16, %18 : vector<32x8xf32>
    %cst_17 = arith.constant 0.000000e+00 : f32
    %20 = vector.broadcast %cst_17 : f32 to vector<32x8xf32>
    %21 = arith.maximumf %19, %20 : vector<32x8xf32>
    %c0_18 = arith.constant 0 : index
    %c0_19 = arith.constant 0 : index
    %22 = vector.load %arg8[%c0_18, %c0_19] : memref<32x1xf32, #tpu.memory_space<vmem>>, vector<32x1xf32>
    %23 = vector.broadcast %22 : vector<32x1xf32> to vector<32x8xf32>
    %24 = arith.mulf %21, %23 : vector<32x8xf32>
    %cst_20 = arith.constant dense<0.000000e+00> : vector<8xf32>
    %25 = vector.multi_reduction <add>, %24, %cst_20 [0] : vector<32x8xf32> to vector<8xf32>
    %26 = vector.shape_cast %25 : vector<8xf32> to vector<1x8xf32>
    %c0_21 = arith.constant 0 : index
    %c0_22 = arith.constant 0 : index
    %27 = memref.load %arg9[%c0_21, %c0_22] : memref<1x1xf32, #tpu.memory_space<smem>>
    %28 = vector.broadcast %27 : f32 to vector<1x8xf32>
    %29 = arith.addf %26, %28 : vector<1x8xf32>
    %c0_23 = arith.constant 0 : index
    %c0_24 = arith.constant 0 : index
    %30 = vector.load %arg10[%c0_23, %c0_24] : memref<1x8xf32, #tpu.memory_space<vmem>>, vector<1x8xf32>
    tpu.vector_store %arg10[%c0_23, %c0_24], %29 {strides = array<i32>} : memref<1x8xf32, #tpu.memory_space<vmem>>, vector<1x8xf32>,
    return
  }
  func.func @transform_0(%arg0: i32) -> (i32, i32) {
    %c0_i32 = arith.constant 0 : i32
    %c0_i32_0 = arith.constant 0 : i32
    return %c0_i32, %arg0 : i32, i32
  }
  func.func @transform_1(%arg0: i32) -> (i32, i32) {
    %c0_i32 = arith.constant 0 : i32
    %c0_i32_0 = arith.constant 0 : i32
    %c0_i32_1 = arith.constant 0 : i32
    return %c0_i32, %c0_i32_0 : i32, i32
  }
  func.func @transform_2(%arg0: i32) -> (i32, i32) {
    %c0_i32 = arith.constant 0 : i32
    %c0_i32_0 = arith.constant 0 : i32
    %c0_i32_1 = arith.constant 0 : i32
    return %c0_i32, %c0_i32_0 : i32, i32
  }
  func.func @transform_3(%arg0: i32) -> (i32, i32) {
    %c0_i32 = arith.constant 0 : i32
    %c0_i32_0 = arith.constant 0 : i32
    %c0_i32_1 = arith.constant 0 : i32
    return %c0_i32, %c0_i32_0 : i32, i32
  }
  func.func @transform_4(%arg0: i32) -> (i32, i32) {
    %c0_i32 = arith.constant 0 : i32
    %c0_i32_0 = arith.constant 0 : i32
    %c0_i32_1 = arith.constant 0 : i32
    return %c0_i32, %c0_i32_0 : i32, i32
  }
  func.func @transform_5(%arg0: i32) -> (i32, i32) {
    %c0_i32 = arith.constant 0 : i32
    %c0_i32_0 = arith.constant 0 : i32
    %c0_i32_1 = arith.constant 0 : i32
    return %c0_i32, %c0_i32_0 : i32, i32
  }
  func.func @transform_6(%arg0: i32) -> (i32, i32) {
    %c0_i32 = arith.constant 0 : i32
    %c0_i32_0 = arith.constant 0 : i32
    %c0_i32_1 = arith.constant 0 : i32
    return %c0_i32, %c0_i32_0 : i32, i32
  }
  func.func @transform_7(%arg0: i32) -> (i32, i32) {
    %c0_i32 = arith.constant 0 : i32
    %c0_i32_0 = arith.constant 0 : i32
    %c0_i32_1 = arith.constant 0 : i32
    return %c0_i32, %c0_i32_0 : i32, i32
  }
  func.func @transform_8(%arg0: i32) -> (i32, i32) {
    %c0_i32 = arith.constant 0 : i32
    %c0_i32_0 = arith.constant 0 : i32
    %c0_i32_1 = arith.constant 0 : i32
    return %c0_i32, %c0_i32_0 : i32, i32
  }
  func.func @transform_9(%arg0: i32) -> (i32, i32) {
    %c0_i32 = arith.constant 0 : i32
    %c0_i32_0 = arith.constant 0 : i32
    return %c0_i32, %arg0 : i32, i32
  }
}

</mosaic_0001>

<bundles_post_ra>
// kernel: tpu_custom_call.1
= control target key start
LH: loop header
LB: loop body
LE: loop exit
PB: predicated region body
PF: predicated region fallthrough
CT: control target
= control target key end

     0   :  { %vm64_vm0 = vcmask 130048   ;;  %v606_v4 = vmov 0   ;;  %s779_s0 = inlined_call_operand.vmem [shape: f32[16,8], index: 0, kind: input, shape index: {}]   ;;  %s780_s1 = inlined_call_operand.vmem [shape: f32[32,16], index: 1, kind: input, shape index: {}]   ;;  %s781_s2 = inlined_call_operand.vmem [shape: f32[32,1], index: 2, kind: input, shape index: {}]   ;;  %s782_s3 = inlined_call_operand.vmem [shape: f32[32,32], index: 3, kind: input, shape index: {}]   ;;  %s783_s4 = inlined_call_operand.vmem [shape: f32[32,1], index: 4, kind: input, shape index: {}]   ;;  %s784_s5 = inlined_call_operand.vmem [shape: f32[32,32], index: 5, kind: input, shape index: {}]   ;;  %s785_s6 = inlined_call_operand.vmem [shape: f32[32,1], index: 6, kind: input, shape index: {}]   ;;  %s786_s7 = inlined_call_operand.vmem [shape: f32[32,1], index: 7, kind: input, shape index: {}]   ;;  %s787_s8 = inlined_call_operand.<no memory space> [shape: f32[1,1], index: 8, kind: input, shape index: {}]   ;;  %s788_s9 = inlined_call_operand.hbm [shape: f32[1,8], index: 9, kind: output, shape index: {}]  }
   0x1   :  { %v34_v0 = vld [vmem:[%s779_s0] sm:$0xff]  ;;  %v35_v1 = vld [vmem:[%s779_s0 + $0x8] sm:$0xff]  ;;  %580 = vset.pattern.permute.xlu0 %v606_v4  ;;  %581 = vset.pattern.permute.xlu1 %v606_v4  ;;  %v42_v6 = vld [vmem:[%s781_s2 + $0x10] sm:$0xff] }
   0x2   :  { %v36_v2 = vld [vmem:[%s780_s1] sm:$0xff]  ;;  %v558_v3 = vpack.c.bf16 %v35_v1, %v34_v0  ;;  %v37_v7 = vld [vmem:[%s780_s1 + $0x8] sm:$0xff]  ;;  %56 = vperm.xlu1 %581, %v42_v6   ;;  %v38_v9 = vld [vmem:[%s780_s1 + $0x10] sm:$0xff] }
   0x3   :  { %524 = vmatprep.mubr.msk.f32.mxu0 %vm64_vm0, %v36_v2  ;;  %v40_v5 = vld [vmem:[%s781_s2] sm:$0xff]  ;;  %v41_v8 = vld [vmem:[%s781_s2 + $0x8] sm:$0xff]  ;;  %v43_v10 = vld [vmem:[%s781_s2 + $0x18] sm:$0xff] }
   0x4   :  { %559 = vmatprep.subr.bf16.mxu0 %v558_v3  ;;  %46 = vperm.xlu0 %580, %v40_v5  }
   0x5   :  { %561 = vmatpush3.bf16.msra.mxu0 %v558_v3 }
   0x8   :  { %525 = vmatmul.mubr.msk.f32.vlgmr.msra.gmra.mrb[0].mxu0 %vm64_vm0, %v37_v7  ;;  %51 = vperm.xlu0 %580, %v41_v8  }
   0x9   :  { %15 = vsyncpa [#allocation4], 0  ;;  %527 = vmatprep.mubr.msk.f32.mxu0 %vm64_vm0, %v38_v9  ;;  %v39_v11 = vld [vmem:[%s780_s1 + $0x18] sm:$0xff]  ;;  %61 = vperm.xlu1 %581, %v43_v10   ;;  %v170_v12 = vld [vmem:[%s783_s4] sm:$0xff]  ;;  %vm194_vm1 = vcmask 261120   ;;  %vm453_vm2 = vcmask 64512  }
   0xa   :  { %v171_v13 = vld [vmem:[%s783_s4 + $0x8] sm:$0xff]  ;;  %v172_v14 = vld [vmem:[%s783_s4 + $0x10] sm:$0xff]  ;;  %v173_v15 = vld [vmem:[%s783_s4 + $0x18] sm:$0xff]  ;;  %s607_s18 = smov [#allocation3]   ;;  %vm470_vm3 = vcmask 57344  }
   0xb   :  { %v300_v16 = vld [vmem:[%s785_s6] sm:$0xff]  ;;  %v301_v17 = vld [vmem:[%s785_s6 + $0x8] sm:$0xff]  ;;  %v302_v18 = vld [vmem:[%s785_s6 + $0x10] sm:$0xff]  ;;  %s478_s0 = sshll.u32 %s607_s18, 4  ;;  %s479_s0 = int_to_ptr.vmem [resolvable:$true] %s478_s0 }
   0xc   :  { %528 = vmatmul.mubr.msk.f32.gmra.mrb[2].mxu0 %vm64_vm0, %v39_v11  ;;  %176 = vperm.xlu0 %580, %v170_v12   ;;  %v303_v19 = vld [vmem:[%s785_s6 + $0x18] sm:$0xff]  ;;  %v425_v20 = vld [vmem:[%s786_s7] sm:$0xff]  ;;  %v426_v21 = vld [vmem:[%s786_s7 + $0x8] sm:$0xff]  ;;  %s582_s19 = scalar_lea.vmem %s479_s0, 16  ;;  %s586_s4 = scalar_lea.vmem %s479_s0, 32 }
   0xd   :  { %181 = vperm.xlu1 %581, %v171_v13   ;;  %v427_v22 = vld [vmem:[%s786_s7 + $0x10] sm:$0xff]  ;;  %v428_v23 = vld [vmem:[%s786_s7 + $0x18] sm:$0xff]  ;;  %v166_v24 = vld [vmem:[%s782_s3] sm:$0xff]  ;;  %p583_p0 = scmp.ne.s32.totalorder %s479_s0, %s582_s19  ;;  %p587_p1 = scmp.lt.s32.totalorder %s479_s0, %s479_s0 }
   0xe   :  { %538 = vmatprep.mubr.msk.f32.mxu1 %vm194_vm1, %v166_v24  ;;  %v167_v43 = vld [vmem:[%s782_s3 + $0x8] sm:$0xff]  ;;  %v168_v44 = vld [vmem:[%s782_s3 + $0x10] sm:$0xff]  ;;  %v169_v45 = vld [vmem:[%s782_s3 + $0x18] sm:$0xff]  ;;  %p588_p2 = scmp.lt.s32.totalorder %s586_s4, %s582_s19 }
   0xf   :  { %v296_v46 = vld [vmem:[%s784_s5] sm:$0xff]  ;;  %v297_v1 = vld [vmem:[%s784_s5 + $0x8] sm:$0xff]  ;;  %v298_v2 = vld [vmem:[%s784_s5 + $0x10] sm:$0xff] }
  0x10   :  { %186 = vperm.xlu0 %580, %v172_v14   ;;  %552 = vmatprep.mubr.msk.f32.mxu0 %vm194_vm1, %v296_v46  ;;  %v299_v3 = vld [vmem:[%s784_s5 + $0x18] sm:$0xff]  ;;  %p589_p3 = por %p588_p2, %p587_p1 }
  0x11   :  { %191 = vperm.xlu1 %581, %v173_v15  }
  0x12   :  { %p590_p4 = pnand %p589_p3, %p583_p0 }
  0x14   :  { %306 = vperm.xlu0 %580, %v300_v16  }
  0x15   :  { %311 = vperm.xlu1 %581, %v301_v17  }
  0x18   :  { %316 = vperm.xlu0 %580, %v302_v18  }
  0x19   :  { %321 = vperm.xlu1 %581, %v303_v19  }
  0x1c   :  { %431 = vperm.xlu0 %580, %v425_v20  }
  0x1d   :  { %436 = vperm.xlu1 %581, %v426_v21  }
  0x20   :  { %441 = vperm.xlu0 %580, %v427_v22  }
  0x21   :  { %446 = vperm.xlu1 %581, %v428_v23  }
  0x81   :  { %v57_v26 = vpop.permute.xlu1 %56 }
  0x83   :  { %v47_v25 = vpop.permute.xlu0 %46 }
  0x87   :  { %v52_v27 = vpop.permute.xlu0 %51 }
  0x88   :  { %v62_v33 = vpop.permute.xlu1 %61 }
  0x8b   :  { %v177_v48 = vpop.permute.xlu0 %176 }
  0x8c   :  { %v182_v47 = vpop.permute.xlu1 %181 }
  0x8f   :  { %v187_v57 = vpop.permute.xlu0 %186 }
  0x90   :  { %v192_v54 = vpop.permute.xlu1 %191 }
  0x93   :  { %v307_v4 = vpop.permute.xlu0 %306 }
  0x94   :  { %v312_v5 = vpop.permute.xlu1 %311 }
  0x97   :  { %v317_v6 = vpop.permute.xlu0 %316 }
  0x98   :  { %v322_v7 = vpop.permute.xlu1 %321 }
  0x9b   :  { %v432_v12 = vpop.permute.xlu0 %431 }
  0x9c   :  { %v437_v13 = vpop.permute.xlu1 %436 }
  0xdb   :  { %v526_v28 = vpop.f32.mrb[0].mxu0 }
  0xdc   :  { %v149_v29 = vadd.f32 %v526_v28, %v52_v27  ;;  %v143_v30 = vpop.f32.mrb[1].mxu0  ;;  %v447_v27 = vpop.permute.xlu1 %446 }
  0xdd   :  { %v144_v31 = vadd.f32 %v143_v30, %v47_v25 }
  0xde   :  { %v163_v32 = vmax.f32 %v149_v29, 0.0 }
  0xdf   :  { %v162_v34 = vmax.f32 %v144_v31, 0.0  ;;  %v529_v35 = vpop.f32.mrb[2].mxu0 }
  0xe0   :  { %v159_v36 = vadd.f32 %v529_v35, %v62_v33  ;;  %v153_v37 = vpop.f32.mrb[3].mxu0 }
  0xe1   :  { %v154_v38 = vadd.f32 %v153_v37, %v57_v26  ;;  %v562_v39 = vpack.c.bf16 %v163_v32, %v162_v34  ;;  %v442_v26 = vpop.permute.xlu0 %441 }
  0xe2   :  { %v165_v40 = vmax.f32 %v159_v36, 0.0 }
  0xe3   :  { %v164_v41 = vmax.f32 %v154_v38, 0.0  ;;  %563 = vmatprep.subr.bf16.mxu1 %v562_v39 }
  0xe4   :  { %565 = vmatpush3.bf16.msra.mxu1 %v562_v39 }
  0xe5   :  { %v566_v42 = vpack.c.bf16 %v165_v40, %v164_v41  ;;  %v468_v40 = vstv %s787_s8 }
  0xe7   :  { %567 = vmatprep.subr.bf16.mxu1 %v566_v42 }
  0xe8   :  { %569 = vmatpush3.bf16.msra.mxu1 %v566_v42 }
  0xeb   :  { %539 = vmatmul.mubr.msk.f32.vlgmr.msra.gmra.mrb[0].mxu1 %vm194_vm1, %v167_v43 }
  0xec   :  { %541 = vmatprep.mubr.msk.f32.mxu1 %vm194_vm1, %v168_v44 }
  0xef   :  { %542 = vmatmul.mubr.msk.f32.gmra.mrb[2].mxu1 %vm194_vm1, %v169_v45 }
 0x1be   :  { %v540_v49 = vpop.f32.mrb[0].mxu1 }
 0x1bf   :  { %v279_v50 = vadd.f32 %v540_v49, %v182_v47  ;;  %v273_v51 = vpop.f32.mrb[1].mxu1 }
 0x1c0   :  { %v274_v52 = vadd.f32 %v273_v51, %v177_v48 }
 0x1c1   :  { %v293_v53 = vmax.f32 %v279_v50, 0.0 }
 0x1c2   :  { %v292_v55 = vmax.f32 %v274_v52, 0.0  ;;  %v543_v56 = vpop.f32.mrb[2].mxu1 }
 0x1c3   :  { %v289_v58 = vadd.f32 %v543_v56, %v192_v54  ;;  %v283_v59 = vpop.f32.mrb[3].mxu1 }
 0x1c4   :  { %v570_v60 = vpack.c.bf16 %v293_v53, %v292_v55  ;;  %v284_v61 = vadd.f32 %v283_v59, %v187_v57 }
 0x1c5   :  { %v295_v62 = vmax.f32 %v289_v58, 0.0 }
 0x1c6   :  { %v294_v63 = vmax.f32 %v284_v61, 0.0  ;;  %571 = vmatprep.subr.bf16.mxu0 %v570_v60 }
 0x1c7   :  { %573 = vmatpush3.bf16.msra.mxu0 %v570_v60 }
 0x1c8   :  { %v574_v0 = vpack.c.bf16 %v295_v62, %v294_v63 }
 0x1ca   :  { %575 = vmatprep.subr.bf16.mxu0 %v574_v0 }
 0x1cb   :  { %577 = vmatpush3.bf16.msra.mxu0 %v574_v0 }
 0x1ce   :  { %553 = vmatmul.mubr.msk.f32.vlgmr.msra.gmra.mrb[4].mxu0 %vm194_vm1, %v297_v1 }
 0x1cf   :  { %555 = vmatprep.mubr.msk.f32.mxu0 %vm194_vm1, %v298_v2 }
 0x1d2   :  { %556 = vmatmul.mubr.msk.f32.gmra.mrb[6].mxu0 %vm194_vm1, %v299_v3 }
 0x2a1   :  { %v554_v8 = vpop.f32.mrb[4].mxu0 }
 0x2a2   :  { %v408_v9 = vadd.f32 %v554_v8, %v312_v5  ;;  %v402_v10 = vpop.f32.mrb[5].mxu0 }
 0x2a3   :  { %v403_v11 = vadd.f32 %v402_v10, %v307_v4 }
 0x2a4   :  { %v422_v14 = vmax.f32 %v408_v9, 0.0 }
 0x2a5   :  { %v421_v15 = vmax.f32 %v403_v11, 0.0  ;;  %v557_v16 = vpop.f32.mrb[6].mxu0 }
 0x2a6   :  { %v450_v17 = vmul.f32 %v437_v13, %v422_v14  ;;  %v418_v18 = vadd.f32 %v557_v16, %v322_v7  ;;  %v412_v19 = vpop.f32.mrb[7].mxu0 }
 0x2a7   :  { %v449_v20 = vmul.f32 %v432_v12, %v421_v15  ;;  %v413_v21 = vadd.f32 %v412_v19, %v317_v6 }
 0x2a8   :  { %v455_v22 = vsel %vm453_vm2, %v450_v17, 0.0  ;;  %v424_v23 = vmax.f32 %v418_v18, 0.0 }
 0x2a9   :  { %v454_v24 = vsel %vm453_vm2, %v449_v20, 0.0  ;;  %v423_v25 = vmax.f32 %v413_v21, 0.0 }
 0x2aa   :  { %v456_v28 = vadd.f32 %v455_v22, %v454_v24  ;;  %v452_v29 = vmul.f32 %v447_v27, %v424_v23 }
 0x2ab   :  { %v451_v30 = vmul.f32 %v442_v26, %v423_v25 }
 0x2ac   :  { %v459_v33 = vsel %vm453_vm2, %v452_v29, 0.0 }
 0x2ad   :  { %v457_v31 = vsel %vm453_vm2, %v451_v30, 0.0 }
 0x2ae   :  { %v458_v32 = vadd.f32 %v457_v31, %v456_v28 }
 0x2b0   :  { %v460_v34 = vadd.f32 %v459_v33, %v458_v32 }
 0x2b2   :  { %v461_v35 = vrot.slane %v460_v34, 4 }
 0x2b4   :  { %v462_v36 = vadd.f32 %v461_v35, %v460_v34 }
 0x2b6   :  { %v463_v37 = vrot.slane %v462_v36, 2 }
 0x2b8   :  { %v464_v38 = vadd.f32 %v463_v37, %v462_v36 }
 0x2ba   :  { %v465_v39 = vrot.slane %v464_v38, 1 }
 0x2bc   :  { %v466_v41 = vadd.f32 %v465_v39, %v464_v38 }
 0x2be   :  { %v469_v42 = vadd.f32 %v468_v40, %v466_v41 }
 0x2c0   :  { %471 = vst.msk [vmem:[#allocation3] sm:$0x1] %vm470_vm3, %v469_v42 }
 0x2c1   :  { %593 = shalt.err (!%p590_p4)
}
 0x2c2   :  { %s594_s22 = scalar_lea.hbm %s788_s9, 16 }
 0x2c3   :  { %p595_p5 = scmp.ne.s32.totalorder %s788_s9, %s594_s22  ;;  %p598_p6 = scmp.lt.u32.totalorder %s594_s22, %s788_s9 }
 0x2c5   :  { %p600_p7 = pnand %p598_p6, %p595_p5 }
 0x2c7   :  { %603 = shalt.err (!%p600_p7)
}
 0x2c8   :  { %481 = dma.vmem_to_hbm [thread:$0]  %s479_s0, 16, %s788_s9, [#allocation4]  }
 0x2c9   :  { %604 = dma.done.wait [#allocation4], 16  }
 0x2ca   :  { %605 = vsyncadd [#allocation4], 4294967280 }
 0x2cb   :  { %485 = vsyncpa [#allocation4], 1 }

</bundles_post_ra>
